<compile_context>
chip_gen: v5e
topology: v5e:2x2
jax: 0.10.0
libtpu: 0.0.40
codegen_flags: <defaults>
</compile_context>

<pallas_src>
import functools

import jax
import jax.numpy as jnp
from jax import lax
from jax.experimental import pallas as pl
from jax.experimental.pallas import tpu as pltpu


def _layernorm(v, w, b, eps):
    mu = jnp.mean(v, axis=-1, keepdims=True)
    var = jnp.mean(jnp.square(v - mu), axis=-1, keepdims=True)
    return (v - mu) * lax.rsqrt(var + eps) * w + b


# --------------------------------------------------------------------------- #
# Kernel 1: LayerNorm1 + fused (scaled-Q | K | V) projection
# --------------------------------------------------------------------------- #
def qkv_kernel(x_ref, n1w_ref, n1b_ref, qkvw_ref, q_ref, k_ref, v_ref, *, c, eps):
    f32, bf16 = jnp.float32, jnp.bfloat16
    xf = x_ref[...].astype(f32)                                    # (TN, C)
    h = _layernorm(xf, n1w_ref[...], n1b_ref[...], eps)
    qkv = jnp.dot(h.astype(bf16), qkvw_ref[...],
                  preferred_element_type=f32).astype(bf16)         # (TN, 3C) bf16
    q_ref[...] = qkv[:, :c]          # softmax scale pre-folded into q weights
    k_ref[...] = qkv[:, c:2 * c]
    v_ref[...] = qkv[:, 2 * c:]


# --------------------------------------------------------------------------- #
# Kernel 2: flash attention + proj residual + LayerNorm2 + MLP residual
# --------------------------------------------------------------------------- #
def block_kernel(xq_ref, q_ref, k_ref, v_ref,
                 pw_ref, pb_ref, n2w_ref, n2b_ref,
                 f1w_ref, f1b_ref, f2w_ref, f2b_ref,
                 o_ref,
                 qh_sc, m_sc, l_sc, acc_sc,
                 *, num_heads, eps, seq_len, seq_pad):
    f32, bf16 = jnp.float32, jnp.bfloat16
    TQ, C = xq_ref.shape
    TKV = k_ref.shape[0]
    H = num_heads
    D = C // H
    kv = pl.program_id(2)

    # ---- per (batch, query-tile) init at first KV step -----------------------
    @pl.when(kv == 0)
    def _():
        qh_sc[...] = q_ref[...].reshape(TQ, H, D).swapaxes(0, 1)   # (H, TQ, D) bf16
        m_sc[...] = jnp.full_like(m_sc, -jnp.inf)
        l_sc[...] = jnp.zeros_like(l_sc)
        acc_sc[...] = jnp.zeros_like(acc_sc)

    kh = k_ref[...].reshape(TKV, H, D).swapaxes(0, 1)              # (H, TKV, D) bf16
    vh = v_ref[...].reshape(TKV, H, D).swapaxes(0, 1)              # (H, TKV, D) bf16

    # scores (softmax scale already folded into Q projection weights)
    s = jnp.einsum("hqd,hkd->hqk", qh_sc[...], kh,
                   preferred_element_type=f32)                     # (H, TQ, TKV) f32

    if seq_len != seq_pad:                 # static: mask zero-padded key columns
        col = lax.broadcasted_iota(jnp.int32, s.shape, 2)
        s = jnp.where(col < (seq_len - kv * TKV), s, jnp.float32(-1e30))

    # ---- online softmax -------------------------------------------------------
    m_prev = m_sc[...]
    m_new = jnp.maximum(m_prev, jnp.max(s, axis=-1, keepdims=True))
    alpha = jnp.exp(m_prev - m_new)
    p = jnp.exp(s - m_new)
    l_sc[...] = alpha * l_sc[...] + jnp.sum(p, axis=-1, keepdims=True)
    acc_sc[...] = alpha * acc_sc[...] + jnp.einsum(
        "hqk,hkd->hqd", p.astype(bf16), vh, preferred_element_type=f32)
    m_sc[...] = m_new

    # ---- finalize on the last KV step: proj + residual, norm2 + MLP + residual
    @pl.when(kv == pl.num_programs(2) - 1)
    def _():
        o = acc_sc[...] * pl.reciprocal(l_sc[...], approx=True)    # (H, TQ, D) f32
        av = o.swapaxes(0, 1).reshape(TQ, C)                       # (TQ, C)
        attn_out = jnp.dot(av.astype(bf16), pw_ref[...],
                           preferred_element_type=f32) + pb_ref[...]
        x1 = xq_ref[...].astype(f32) + attn_out

        h2 = _layernorm(x1, n2w_ref[...], n2b_ref[...], eps)
        g = jnp.dot(h2.astype(bf16), f1w_ref[...],
                    preferred_element_type=f32) + f1b_ref[...]
        # exact (erf-based) GELU, matching nn.GELU default
        g = 0.5 * g * (1.0 + lax.erf(g * jnp.float32(0.7071067811865476)))
        mo = jnp.dot(g.astype(bf16), f2w_ref[...],
                     preferred_element_type=f32) + f2b_ref[...]
        o_ref[...] = (x1 + mo).astype(o_ref.dtype)


# --------------------------------------------------------------------------- #
# Tiling / VMEM helpers
# --------------------------------------------------------------------------- #
def _round_up(x, m):
    return ((x + m - 1) // m) * m


def _pick_tiles(n):
    """Query tile (128/256-aligned), KV tile, padded sequence length."""
    if n <= 256:
        tq = _round_up(n, 8)
        tkv = tq
    else:
        tq = 256
        tkv = 512 if n >= 512 else 256
    n_pad = _round_up(n, tkv)        # tkv is a multiple of tq, so n_pad % tq == 0
    return tq, tkv, n_pad


def _vmem_capacity():
    try:
        return int(pltpu.get_tpu_info().vmem_capacity_bytes)
    except Exception:
        return 64 << 20              # conservative (v7x per-TC physical VMEM)


def _vmem_limit(tq, tkv, c, h, d, hidden):
    lane = 128
    cap = _vmem_capacity()
    weights = 2 * (4 * c * c + 2 * c * hidden)                 # bf16, single-buffered
    stream = 2 * (tq * c * 6 + 2 * tkv * c * 2 + tq * c * 4)   # x/q/k/v/out blocks, 2-buf
    scratch = h * tq * (_round_up(d, lane) * 6 + 2 * lane * 4)
    scores = 3 * h * tq * tkv * 4                              # s, p, transients
    mlp = 2 * tq * hidden * 4
    est = weights + stream + scratch + scores + mlp + (8 << 20)
    hi = cap - (8 << 20)
    lo = min(32 << 20, hi)
    return int(max(lo, min(est, hi)))


# --------------------------------------------------------------------------- #
# Wrapper
# --------------------------------------------------------------------------- #
def transformer_block(x, params, *, num_heads, eps=1e-5):
    """x: (B, N, C) float32. params: dict of pre-transposed (in, out) weights."""
    B, N, C = x.shape
    H = num_heads
    D = C // H
    scale = float(D) ** -0.5
    hidden = params["fc1_w"].shape[1]
    bf16 = jnp.bfloat16

    TQ, TKV, N_pad = _pick_tiles(N)
    x_p = x if N_pad == N else jnp.pad(x, ((0, 0), (0, N_pad - N), (0, 0)))

    # Fold softmax scale into Q weights; fuse Q|K|V into one (C, 3C) bf16 matmul.
    qkv_w = jnp.concatenate(
        [params["q_w"] * scale, params["k_w"], params["v_w"]], axis=1).astype(bf16)

    vmem_limit = _vmem_limit(TQ, TKV, C, H, D, hidden)

    # ---- kernel 1: LayerNorm1 + fused QKV projection --------------------------
    def w_spec1(a):
        return pl.BlockSpec(a.shape, lambda b, t, _n=a.ndim: (0,) * _n,
                            pipeline_mode=pl.Buffered(1))

    q_bf, k_bf, v_bf = pl.pallas_call(
        functools.partial(qkv_kernel, c=C, eps=eps),
        out_shape=[jax.ShapeDtypeStruct((B, N_pad, C), bf16)] * 3,
        grid=(B, N_pad // TKV),
        in_specs=[pl.BlockSpec((None, TKV, C), lambda b, t: (b, t, 0)),
                  w_spec1(params["n1_w"]), w_spec1(params["n1_b"]),
                  w_spec1(qkv_w)],
        out_specs=[pl.BlockSpec((None, TKV, C), lambda b, t: (b, t, 0))] * 3,
        compiler_params=pltpu.CompilerParams(
            dimension_semantics=("parallel", "parallel"),
            vmem_limit_bytes=vmem_limit),
    )(x_p, params["n1_w"], params["n1_b"], qkv_w)

    # ---- kernel 2: flash attention + residuals + MLP ---------------------------
    w2 = [params["proj_w"].astype(bf16), params["proj_b"],
          params["n2_w"], params["n2_b"],
          params["fc1_w"].astype(bf16), params["fc1_b"],
          params["fc2_w"].astype(bf16), params["fc2_b"]]

    def w_spec2(a):
        return pl.BlockSpec(a.shape, lambda b, q, kv, _n=a.ndim: (0,) * _n,
                            pipeline_mode=pl.Buffered(1))

    out = pl.pallas_call(
        functools.partial(block_kernel, num_heads=H, eps=eps,
                          seq_len=N, seq_pad=N_pad),
        out_shape=jax.ShapeDtypeStruct((B, N_pad, C), x.dtype),
        grid=(B, N_pad // TQ, N_pad // TKV),
        in_specs=[pl.BlockSpec((None, TQ, C), lambda b, q, kv: (b, q, 0)),    # residual x
                  pl.BlockSpec((None, TQ, C), lambda b, q, kv: (b, q, 0)),    # scaled Q
                  pl.BlockSpec((None, TKV, C), lambda b, q, kv: (b, kv, 0)),  # K tile
                  pl.BlockSpec((None, TKV, C), lambda b, q, kv: (b, kv, 0))]  # V tile
                 + [w_spec2(p) for p in w2],
        out_specs=pl.BlockSpec((None, TQ, C), lambda b, q, kv: (b, q, 0)),
        scratch_shapes=[pltpu.VMEM((H, TQ, D), bf16),          # Q in head layout
                        pltpu.VMEM((H, TQ, 1), jnp.float32),   # running max
                        pltpu.VMEM((H, TQ, 1), jnp.float32),   # running sum
                        pltpu.VMEM((H, TQ, D), jnp.float32)],  # output accumulator
        compiler_params=pltpu.CompilerParams(
            dimension_semantics=("parallel", "parallel", "arbitrary"),
            vmem_limit_bytes=vmem_limit),
    )(x_p, q_bf, k_bf, v_bf, *w2)

    return out if N_pad == N else out[:, :N, :]


# --------------------------------------------------------------------------- #
# Pure-JAX reference and params
# --------------------------------------------------------------------------- #
def block_reference(x, params, *, num_heads, eps=1e-5):
    """Pure-JAX f32 reference reproducing the PyTorch Block forward."""
    B, N, C = x.shape
    D = C // num_heads
    scale = float(D) ** -0.5

    def ln(v, w, b):
        mu = v.mean(-1, keepdims=True)
        var = ((v - mu) ** 2).mean(-1, keepdims=True)
        return (v - mu) / jnp.sqrt(var + eps) * w + b

    h = ln(x, params["n1_w"], params["n1_b"])
    q = (h @ params["q_w"]).reshape(B, N, num_heads, D).transpose(0, 2, 1, 3)
    k = (h @ params["k_w"]).reshape(B, N, num_heads, D).transpose(0, 2, 1, 3)
    v = (h @ params["v_w"]).reshape(B, N, num_heads, D).transpose(0, 2, 1, 3)
    attn = jnp.einsum("bhnd,bhmd->bhnm", q, k) * scale
    attn = jax.nn.softmax(attn, axis=-1)
    av = jnp.einsum("bhnm,bhmd->bhnd", attn, v).transpose(0, 2, 1, 3).reshape(B, N, C)
    x = x + (av @ params["proj_w"] + params["proj_b"])

    h2 = ln(x, params["n2_w"], params["n2_b"])
    g = h2 @ params["fc1_w"] + params["fc1_b"]
    g = 0.5 * g * (1.0 + lax.erf(g * jnp.float32(0.7071067811865476)))
    x = x + (g @ params["fc2_w"] + params["fc2_b"])
    return x


def init_params(key, dim, num_heads, mlp_ratio=4.0):
    hidden = int(dim * mlp_ratio)
    ks = jax.random.split(key, 6)
    w = lambda k, s: (0.02 * jax.random.normal(k, s)).astype(jnp.float32)
    return {
        "n1_w": jnp.ones((1, dim), jnp.float32),
        "n1_b": jnp.zeros((1, dim), jnp.float32),
        "q_w": w(ks[0], (dim, dim)),
        "k_w": w(ks[1], (dim, dim)),
        "v_w": w(ks[2], (dim, dim)),
        "proj_w": w(ks[3], (dim, dim)),
        "proj_b": jnp.zeros((1, dim), jnp.float32),
        "n2_w": jnp.ones((1, dim), jnp.float32),
        "n2_b": jnp.zeros((1, dim), jnp.float32),
        "fc1_w": w(ks[4], (dim, hidden)),
        "fc1_b": jnp.zeros((1, hidden), jnp.float32),
        "fc2_w": w(ks[5], (hidden, dim)),
        "fc2_b": jnp.zeros((1, dim), jnp.float32),
    }


if __name__ == "__main__":
    key = jax.random.PRNGKey(0)
    kx, kp, kx2, kp2, kx3, kp3 = jax.random.split(key, 6)

    # --- primary small test (single tile) ------------------------------------
    B, N, C, H = 2, 8, 32, 4
    x = jax.random.normal(kx, (B, N, C), dtype=jnp.float32)
    params = init_params(kp, C, H)
    out = jax.block_until_ready(transformer_block(x, params, num_heads=H))
    ref = jax.block_until_ready(block_reference(x, params, num_heads=H))
    assert out.shape == (B, N, C)
    assert jnp.allclose(out, ref, rtol=2e-2, atol=2e-2), \
        f"max abs diff {jnp.max(jnp.abs(out - ref))}"

    # --- multiple query tiles, single KV tile ---------------------------------
    B2, N2, C2, H2 = 1, 512, 64, 4
    x2 = jax.random.normal(kx2, (B2, N2, C2), dtype=jnp.float32)
    params2 = init_params(kp2, C2, H2)
    out2 = jax.block_until_ready(transformer_block(x2, params2, num_heads=H2))
    ref2 = jax.block_until_ready(block_reference(x2, params2, num_heads=H2))
    assert jnp.allclose(out2, ref2, rtol=2e-2, atol=2e-2), \
        f"max abs diff {jnp.max(jnp.abs(out2 - ref2))}"

    # --- padded N: multi-step online softmax + padded-key masking -------------
    B3, N3, C3, H3 = 1, 300, 64, 4
    x3 = jax.random.normal(kx3, (B3, N3, C3), dtype=jnp.float32)
    params3 = init_params(kp3, C3, H3)
    out3 = jax.block_until_ready(transformer_block(x3, params3, num_heads=H3))
    ref3 = jax.block_until_ready(block_reference(x3, params3, num_heads=H3))
    assert out3.shape == (B3, N3, C3)
    assert jnp.allclose(out3, ref3, rtol=2e-2, atol=2e-2), \
        f"max abs diff {jnp.max(jnp.abs(out3 - ref3))}"

    print("KERNEL_OK")
</pallas_src>

<mosaic_0001>
module attributes {stable_mosaic.version = 11 : i64} {
  func.func @qkv_kernel(%arg0: i32, %arg1: i32, %arg2: memref<1x8x32xf32, #tpu.memory_space<vmem>>, %arg3: memref<1x32xf32, #tpu.memory_space<vmem>>, %arg4: memref<1x32xf32, #tpu.memory_space<vmem>>, %arg5: memref<32x96xbf16, #tpu.memory_space<vmem>>, %arg6: memref<1x8x32xbf16, #tpu.memory_space<vmem>>, %arg7: memref<1x8x32xbf16, #tpu.memory_space<vmem>>, %arg8: memref<1x8x32xbf16, #tpu.memory_space<vmem>>) attributes {dimension_semantics = [#tpu.dimension_semantics<parallel>, #tpu.dimension_semantics<parallel>], iteration_bounds = array<i64: 2, 1>, scalar_prefetch = 0 : i64, scratch_operands = 0 : i64, tpu.core_type = #tpu.core_type<tc>, window_params = [{transform_indices = @transform_0, window_bounds = array<i64: 1, 8, 32>}, {pipeline_mode = #tpu.pipeline_mode<synchronous>, transform_indices = @transform_1, window_bounds = array<i64: 1, 32>}, {pipeline_mode = #tpu.pipeline_mode<synchronous>, transform_indices = @transform_2, window_bounds = array<i64: 1, 32>}, {pipeline_mode = #tpu.pipeline_mode<synchronous>, transform_indices = @transform_3, window_bounds = array<i64: 32, 96>}, {transform_indices = @transform_4, window_bounds = array<i64: 1, 8, 32>}, {transform_indices = @transform_5, window_bounds = array<i64: 1, 8, 32>}, {transform_indices = @transform_6, window_bounds = array<i64: 1, 8, 32>}]} {
    %c0 = arith.constant 0 : index
    %c0_0 = arith.constant 0 : index
    %c0_1 = arith.constant 0 : index
    %0 = vector.load %arg2[%c0, %c0_0, %c0_1] : memref<1x8x32xf32, #tpu.memory_space<vmem>>, vector<1x8x32xf32>
    %1 = vector.shape_cast %0 : vector<1x8x32xf32> to vector<8x32xf32>
    %c0_2 = arith.constant 0 : index
    %c0_3 = arith.constant 0 : index
    %2 = vector.load %arg3[%c0_2, %c0_3] : memref<1x32xf32, #tpu.memory_space<vmem>>, vector<1x32xf32>
    %c0_4 = arith.constant 0 : index
    %c0_5 = arith.constant 0 : index
    %3 = vector.load %arg4[%c0_4, %c0_5] : memref<1x32xf32, #tpu.memory_space<vmem>>, vector<1x32xf32>
    %cst = arith.constant dense<0.000000e+00> : vector<8xf32>
    %4 = vector.multi_reduction <add>, %1, %cst [1] : vector<8x32xf32> to vector<8xf32>
    %5 = vector.shape_cast %4 : vector<8xf32> to vector<8x1xf32>
    %cst_6 = arith.constant 3.200000e+01 : f32
    %6 = vector.broadcast %cst_6 : f32 to vector<8x1xf32>
    %7 = arith.divf %5, %6 : vector<8x1xf32>
    %8 = vector.broadcast %7 : vector<8x1xf32> to vector<8x32xf32>
    %9 = arith.subf %1, %8 : vector<8x32xf32>
    %10 = arith.mulf %9, %9 : vector<8x32xf32>
    %cst_7 = arith.constant dense<0.000000e+00> : vector<8xf32>
    %11 = vector.multi_reduction <add>, %10, %cst_7 [1] : vector<8x32xf32> to vector<8xf32>
    %12 = vector.shape_cast %11 : vector<8xf32> to vector<8x1xf32>
    %cst_8 = arith.constant 3.200000e+01 : f32
    %13 = vector.broadcast %cst_8 : f32 to vector<8x1xf32>
    %14 = arith.divf %12, %13 : vector<8x1xf32>
    %15 = vector.broadcast %7 : vector<8x1xf32> to vector<8x32xf32>
    %16 = arith.subf %1, %15 : vector<8x32xf32>
    %cst_9 = arith.constant 9.99999974E-6 : f32
    %17 = vector.broadcast %cst_9 : f32 to vector<8x1xf32>
    %18 = arith.addf %14, %17 : vector<8x1xf32>
    %19 = math.rsqrt %18 : vector<8x1xf32>
    %20 = vector.broadcast %19 : vector<8x1xf32> to vector<8x32xf32>
    %21 = arith.mulf %16, %20 : vector<8x32xf32>
    %22 = vector.broadcast %2 : vector<1x32xf32> to vector<8x32xf32>
    %23 = arith.mulf %21, %22 : vector<8x32xf32>
    %24 = vector.broadcast %3 : vector<1x32xf32> to vector<8x32xf32>
    %25 = arith.addf %23, %24 : vector<8x32xf32>
    %26 = arith.truncf %25 : vector<8x32xf32> to vector<8x32xbf16>
    %c0_10 = arith.constant 0 : index
    %c0_11 = arith.constant 0 : index
    %27 = vector.load %arg5[%c0_10, %c0_11] : memref<32x96xbf16, #tpu.memory_space<vmem>>, vector<32x96xbf16>
    %cst_12 = arith.constant dense<0.000000e+00> : vector<8x96xf32>
    %28 = tpu.matmul %26, %27, %cst_12 {dimension_numbers = #tpu.dot_dimension_numbers<[1], [0], [0], [1], [0, 0, 1, 1], [], []>} : vector<8x32xbf16>, vector<32x96xbf16>, vector<8x96xf32> -> vector<8x96xf32>
    %29 = arith.truncf %28 : vector<8x96xf32> to vector<8x96xbf16>
    %30 = vector.extract_strided_slice %29 {offsets = [0, 0], sizes = [8, 32], strides = [1, 1]} : vector<8x96xbf16> to vector<8x32xbf16>
    %c0_13 = arith.constant 0 : index
    %c0_14 = arith.constant 0 : index
    %c0_15 = arith.constant 0 : index
    %31 = vector.load %arg6[%c0_13, %c0_14, %c0_15] : memref<1x8x32xbf16, #tpu.memory_space<vmem>>, vector<1x8x32xbf16>
    %32 = vector.shape_cast %31 : vector<1x8x32xbf16> to vector<8x32xbf16>
    %33 = vector.shape_cast %30 : vector<8x32xbf16> to vector<1x8x32xbf16>
    tpu.vector_store %arg6[%c0_13, %c0_14, %c0_15], %33 {strides = array<i32>} : memref<1x8x32xbf16, #tpu.memory_space<vmem>>, vector<1x8x32xbf16>,
    %34 = vector.extract_strided_slice %29 {offsets = [0, 32], sizes = [8, 32], strides = [1, 1]} : vector<8x96xbf16> to vector<8x32xbf16>
    %c0_16 = arith.constant 0 : index
    %c0_17 = arith.constant 0 : index
    %c0_18 = arith.constant 0 : index
    %35 = vector.load %arg7[%c0_16, %c0_17, %c0_18] : memref<1x8x32xbf16, #tpu.memory_space<vmem>>, vector<1x8x32xbf16>
    %36 = vector.shape_cast %35 : vector<1x8x32xbf16> to vector<8x32xbf16>
    %37 = vector.shape_cast %34 : vector<8x32xbf16> to vector<1x8x32xbf16>
    tpu.vector_store %arg7[%c0_16, %c0_17, %c0_18], %37 {strides = array<i32>} : memref<1x8x32xbf16, #tpu.memory_space<vmem>>, vector<1x8x32xbf16>,
    %38 = vector.extract_strided_slice %29 {offsets = [0, 64], sizes = [8, 32], strides = [1, 1]} : vector<8x96xbf16> to vector<8x32xbf16>
    %c0_19 = arith.constant 0 : index
    %c0_20 = arith.constant 0 : index
    %c0_21 = arith.constant 0 : index
    %39 = vector.load %arg8[%c0_19, %c0_20, %c0_21] : memref<1x8x32xbf16, #tpu.memory_space<vmem>>, vector<1x8x32xbf16>
    %40 = vector.shape_cast %39 : vector<1x8x32xbf16> to vector<8x32xbf16>
    %41 = vector.shape_cast %38 : vector<8x32xbf16> to vector<1x8x32xbf16>
    tpu.vector_store %arg8[%c0_19, %c0_20, %c0_21], %41 {strides = array<i32>} : memref<1x8x32xbf16, #tpu.memory_space<vmem>>, vector<1x8x32xbf16>,
    return
  }
  func.func @transform_0(%arg0: i32, %arg1: i32) -> (i32, i32, i32) {
    %c0_i32 = arith.constant 0 : i32
    %c0_i32_0 = arith.constant 0 : i32
    return %arg0, %arg1, %c0_i32 : i32, i32, i32
  }
  func.func @transform_1(%arg0: i32, %arg1: i32) -> (i32, i32) {
    %c0_i32 = arith.constant 0 : i32
    %c0_i32_0 = arith.constant 0 : i32
    %c0_i32_1 = arith.constant 0 : i32
    return %c0_i32, %c0_i32_0 : i32, i32
  }
  func.func @transform_2(%arg0: i32, %arg1: i32) -> (i32, i32) {
    %c0_i32 = arith.constant 0 : i32
    %c0_i32_0 = arith.constant 0 : i32
    %c0_i32_1 = arith.constant 0 : i32
    return %c0_i32, %c0_i32_0 : i32, i32
  }
  func.func @transform_3(%arg0: i32, %arg1: i32) -> (i32, i32) {
    %c0_i32 = arith.constant 0 : i32
    %c0_i32_0 = arith.constant 0 : i32
    %c0_i32_1 = arith.constant 0 : i32
    return %c0_i32, %c0_i32_0 : i32, i32
  }
  func.func @transform_4(%arg0: i32, %arg1: i32) -> (i32, i32, i32) {
    %c0_i32 = arith.constant 0 : i32
    %c0_i32_0 = arith.constant 0 : i32
    return %arg0, %arg1, %c0_i32 : i32, i32, i32
  }
  func.func @transform_5(%arg0: i32, %arg1: i32) -> (i32, i32, i32) {
    %c0_i32 = arith.constant 0 : i32
    %c0_i32_0 = arith.constant 0 : i32
    return %arg0, %arg1, %c0_i32 : i32, i32, i32
  }
  func.func @transform_6(%arg0: i32, %arg1: i32) -> (i32, i32, i32) {
    %c0_i32 = arith.constant 0 : i32
    %c0_i32_0 = arith.constant 0 : i32
    return %arg0, %arg1, %c0_i32 : i32, i32, i32
  }
}

</mosaic_0001>

<bundles_post_ra>
// kernel: tpu_custom_call.1
= control target key start
LH: loop header
LB: loop body
LE: loop exit
PB: predicated region body
PF: predicated region fallthrough
CT: control target
= control target key end

     0   :  { %s1262_s0 = inlined_call_operand.hbm [shape: f32[2,8,32], index: 0, kind: input, shape index: {}]   ;;  %s1263_s1 = inlined_call_operand.hbm [shape: f32[1,32], index: 1, kind: input, shape index: {}]   ;;  %s1264_s2 = inlined_call_operand.vmem [shape: f32[1,32], index: 2, kind: input, shape index: {}]   ;;  %s1265_s3 = inlined_call_operand.hbm [shape: bf16[32,96], index: 3, kind: input, shape index: {}]   ;;  %s1266_s4 = inlined_call_operand.hbm [shape: bf16[2,8,32], index: 4, kind: output, shape index: {0}]   ;;  %s1267_s5 = inlined_call_operand.hbm [shape: bf16[2,8,32], index: 5, kind: output, shape index: {1}]   ;;  %s1268_s6 = inlined_call_operand.hbm [shape: bf16[2,8,32], index: 6, kind: output, shape index: {2}]  }
   0x1   :  { %1270 = sst [smem:[#allocation16_spill]] %s1262_s0 }
   0x2   :  { %1271 = sst [smem:[#allocation17_spill]] %s1263_s1 }
   0x3   :  { %12 = vsyncpa [#allocation3], 0 }
   0x4   :  { %14 = vsyncpa [#allocation3 + $0x1], 0 }
   0x5   :  { %15 = vsyncpa [#allocation6], 0 }
   0x6   :  { %16 = vsyncpa [#allocation4], 0 }
   0x7   :  { %18 = vsyncpa [#allocation4 + $0x1], 0 }
   0x8   :  { %19 = vsyncpa [#allocation10], 0 }
   0x9   :  { %21 = vsyncpa [#allocation10 + $0x1], 0  ;;  %s1065_s21 = smov 0   ;;  %s1067_s22 = smov 0  }
   0xa   :  { %s1069_s23 = smov 0   ;;  %s1071_s24 = smov 0  }
   0xb   :  { %s1073_s25 = smov 0   ;;  %s1075_s26 = smov 0  }
   0xc LB: > { %s1096_s27 = sadd.s32 4294967295, %s1021_s26   ;;  %s1269_s28 = sadd.s32 4294967294, %s1021_s26   ;;  %s1021_s26 = sphi %s1075_s26, %s27_s26   ;;  %s1017_s25 = sphi %s1073_s25, %s1283_s25   ;;  %s1013_s24 = sphi %s1071_s24, %s1282_s24   ;;  %s1009_s23 = sphi %s1069_s23, %s1281_s23   ;;  %s1005_s22 = sphi %s1067_s22, %s1280_s22   ;;  %s1001_s21 = sphi %s1065_s21, %s1279_s21  }
   0xd   : > { %p61_p0 = scmp.ne.s32.totalorder %s1005_s22, %s1001_s21  ;;  %p62_p1 = scmp.eq.s32.totalorder %s1096_s27, 0 }
   0xe   : > { %p156_p2 = scmp.eq.s32.totalorder %s1269_s28, 1  ;;  %p649_p4 = scmp.ge.s32.totalorder %s1021_s26, 1 }
   0xf   : > { %p1106_p3 = por %p62_p1, %p61_p0  ;;  %p219_p6 = scmp.lt.s32.totalorder %s1021_s26, 3 }
  0x10   : > { %p1111_p5 = por %p156_p2, %p61_p0  ;;  %s1274_s1 = sld [smem:[#allocation17_spill]] }
  0x11   : > { %p1119_p7 = pnand %p649_p4, %p219_p6  ;;  %p652_p8 = scmp.ge.s32.totalorder %s1021_s26, 2 }
  0x12   : > { %s1023_s11 = smov [#allocation5]   ;;  %s245_s15 = sshll.u32 %s1265_s3, 4  ;;  %s246_s15 = int_to_ptr.hbm [resolvable:$true] %s245_s15 }
  0x13   : > { %p697_p9 = pneg %p1119_p7  ;;  %s233_s12 = sshll.u32 %s1023_s11, 4  ;;  %s234_s12 = int_to_ptr.vmem [resolvable:$true] %s233_s12 }
  0x14   : > { %s1024_s16 = smov [#allocation7]   ;;  %s1025_s18 = smov 64  }
  0x15   : > { %p698_p10 = pnand %p697_p9, %p62_p1  ;;  %s247_s17 = sshll.u32 %s1024_s16, 4  ;;  %s248_s17 = int_to_ptr.vmem [resolvable:$true] %s247_s17 }
  0x16   : > { %s231_s9 = sshll.u32 %s1274_s1, 4  ;;  %s1026_s19 = smov 4   ;;  %s232_s9 = int_to_ptr.hbm [resolvable:$true] %s231_s9 }
  0x17   : > { %700 = dma.hbm_to_vmem [thread:$0]  (!%p698_p10), %s232_s9, 16, %s234_s12, [#allocation6]  }
  0x18   : > { %703 = dma.hbm_to_vmem [thread:$0]  (!%p698_p10), %s246_s15, 256, %s248_s17, [#allocation6], %s1025_s18, %s1025_s18, %s1026_s19  }
  0x19   : > { %p150_p11 = scmp.eq.s32.totalorder %s1096_s27, 1  ;;  %s39_s20 = sadd.s32 1, %s1017_s25 }
  0x1a   : > { %p41_p12 = scmp.ge.s32.totalorder %s39_s20, 2  ;;  %s48_s7 = sadd.s32 1, %s1009_s23 }
  0x1b   : > { %p55_p13 = scmp.ne.s32.totalorder %s1009_s23, %s1005_s22  ;;  %p56_p0 = scmp.eq.s32.totalorder %s1021_s26, 0 }
  0x1c   : > { %s1285_s20 = smov (%p41_p12, %s39_s20), 0  ;;  %p720_p4 = scmp.lt.s32.totalorder %s1021_s26, 2 }
  0x1d   : > { %p1139_p2 = por %p150_p11, %p55_p13  ;;  %s43_s9 = ssub.s32 %s1017_s25, %s1285_s20 }
  0x1e   : > { %s261_s11 = sand.u32 1, %s1009_s23   ;;  %p46_p6 = scmp.eq.s32.totalorder %s43_s9, 0 }
  0x1f   : > { %p57_p9 = por %p56_p0, %p55_p13  ;;  %s653_s12 = sshll.u32 %s261_s11, 3 }
  0x20   : > { %s654_s13 = sshll.u32 %s1017_s25, 3  ;;  %s1277_s0 = sld [smem:[#allocation16_spill]] }
  0x21   : > { %s1149_s14 = scalar_select %p46_p6, %s1009_s23, %s48_s7  }
  0x22   : > { %s265_s19 = scalar_lea.vmem [#allocation2], %s653_s12  ;;  %p705_p10 = pnand %p720_p4, %p57_p9 }
  0x23   : > { %s274_s28 = sshll.u32 %s265_s19, 4  ;;  %s262_s1 = scalar_lea.sflag [#allocation3], %s261_s11  ;;  %s275_s28 = int_to_ptr.vmem [resolvable:$true] %s274_s28 }
  0x24   : > { %283 = sbr.rel (%p1119_p7) target bundleno = 574 (0x23e), region = 36  ;;  %s1159_s7 = sand.u32 (!%p1119_p7), 1, %s1005_s22  }
  0x25   : > { %s656_s9 = sshll.u32 (!%p1119_p7), %s1159_s7, 3 }
  0x26   : > { %s270_s17 = scalar_lea.hbm %s1277_s0, %s654_s13  ;;  %s286_s13 = scalar_lea.sflag (!%p1119_p7), [#allocation3], %s1159_s7 }
  0x27   : > { %s272_s18 = sshll.u32 %s270_s17, 4  ;;  %s289_s15 = scalar_lea.vmem (!%p1119_p7), [#allocation2], %s656_s9  ;;  %s273_s18 = int_to_ptr.hbm [resolvable:$true] %s272_s18 }
  0x28   : > { %707 = dma.hbm_to_vmem [thread:$0]  (!%p705_p10), %s273_s18, 128, %s275_s28, %s262_s1  }
  0x29   : > { %984 = dma.done.wait (%p1106_p3), %s286_s13, 128  }
  0x2a   : > { %986 = vsyncadd (%p1106_p3), %s286_s13, 4294967168 }
  0x2b   : > { %988 = dma.done.wait (%p62_p1), [#allocation6], 272  }
  0x2c   : > { %990 = vsyncadd (%p62_p1), [#allocation6], 4294967024  ;;  %vm343_vm0 = vcmask 261120   ;;  %v340_v0 = vld [vmem:[%s289_s15] sm:$0xff]  ;;  %v1027_v2 = vmov 32.0   ;;  %v679_v15 = vld [vmem:[#allocation7] sm:$0xff] }
  0x2d   : > { %v344_v1 = vsel %vm343_vm0, %v340_v0, 0.0  ;;  %781 = vrcp.f32 %v1027_v2  ;;  %v680_v14 = vld [vmem:[#allocation7 + $0x8] sm:$0xff]  ;;  %v779_v25 = vld [vmem:[#allocation5] ss:$0 sm:$0xff]  ;;  %s1178_s29 = sshll.u32 %s1159_s7, 2  ;;  %s1181_s10 = sshll.u32 %s1013_s24, 2 }
  0x2e   : > { %345 = vadd.xlane.f32.xlu0 %v344_v1  ;;  %407 = vmatpush.bf16.msra.mxu0 %v680_v14  ;;  %v780_v28 = vld [vmem:[%s1264_s2] ss:$0 sm:$0xff]  ;;  %s448_s16 = scalar_lea.hbm %s1266_s4, %s1181_s10  ;;  %vm415_vm5 = vcmask 257024   ;;  %s324_s17 = scalar_lea.vmem [#allocation8], %s1178_s29 }
  0x2f   : > { %s450_s18 = sshll.u32 %s324_s17, 4  ;;  %s452_s19 = sshll.u32 %s448_s16, 4  ;;  %s451_s18 = int_to_ptr.vmem [resolvable:$true] %s450_s18  ;;  %s453_s19 = int_to_ptr.hbm [resolvable:$true] %s452_s19 }
  0x30   : > { %s1028_s9 = smov 96   ;;  %s427_s24 = scalar_lea.sflag [#allocation4], %s1159_s7 }
  0x31   : > { %s889_s13 = sshra.s32 %s453_s19, 4  ;;  %s895_s11 = scalar_lea.hbm %s1266_s4, 8  ;;  %s890_s13 = int_to_ptr.hbm [resolvable:$true] %s889_s13 }
  0x32   : > { %408 = vmatpush.bf16.msra.mxu0 %v679_v15  ;;  %s891_s15 = scalar_lea.hbm %s890_s13, 4  ;;  %p896_p11 = scmp.lt.s32.totalorder %s890_s13, %s1266_s4 }
  0x33   : > { %v782_v3 = vpop.eup %781  ;;  %p892_p1 = scmp.ne.s32.totalorder %s890_s13, %s891_s15  ;;  %p897_p12 = scmp.lt.s32.totalorder %s895_s11, %s891_s15 }
  0x34   : > { %v348_v4 = vmul.f32 32.0, %v782_v3  ;;  %vm352_vm1 = vweird.f32 %v782_v3 }
  0x35   : > { %p893_p3 = pnand %p892_p1, %p1139_p2  ;;  %p898_p13 = por %p897_p12, %p896_p11 }
  0x36   : > { %v349_v5 = vsub.f32 1.0, %v348_v4 }
  0x37   : > { %p894_p7 = pneg %p893_p3 }
  0x38   : > { %v350_v6 = vmul.f32 %v782_v3, %v349_v5 }
  0x39   : > { %p899_p0 = pnand %p898_p13, %p894_p7 }
  0x3a   : > { %v351_v7 = vadd.f32 %v782_v3, %v350_v6 }
  0x3c   : > { %v353_v8 = vsel %vm352_vm1, %v782_v3, %v351_v7 }
  0xa1   : > { %v346_v9 = vpop.xlane.xlu0 %345 }
  0xa2   : > { %v354_v10 = vmul.f32 %v353_v8, %v346_v9 }
  0xa4   : > { %v355_v11 = vsub.f32 %v340_v0, %v354_v10 }
  0xa6   : > { %v356_v12 = vmul.f32 %v355_v11, %v355_v11 }
  0xa8   : > { %v357_v13 = vsel %vm343_vm0, %v356_v12, 0.0 }
  0xa9   : > { %358 = vadd.xlane.f32.xlu0 %v357_v13 }
 0x11c   : > { %v359_v16 = vpop.xlane.xlu0 %358 }
 0x11d   : > { %v360_v17 = vmul.f32 %v359_v16, %v353_v8 }
 0x11f   : > { %v361_v18 = vadd.f32 1e-05, %v360_v17 }
 0x121   : > { %783 = vrsqrt.f32 %v361_v18  ;;  %vm368_vm3 = vweird.f32 %v361_v18 }
 0x127   : > { %v784_v19 = vpop.eup %783 }
 0x128   : > { %v363_v20 = vmul.f32 %v784_v19, %v361_v18  ;;  %vm369_vm2 = vweird.f32 %v784_v19 }
 0x129   : > { %vm370_vm4 = vmor %vm368_vm3, %vm369_vm2 }
 0x12a   : > { %v364_v21 = vmul.f32 %v784_v19, %v363_v20 }
 0x12c   : > { %v365_v22 = vmul.f32 0.5, %v364_v21 }
 0x12e   : > { %v366_v23 = vsub.f32 1.5, %v365_v22 }
 0x130   : > { %v367_v24 = vmul.f32 %v784_v19, %v366_v23 }
 0x132   : > { %v371_v26 = vsel %vm370_vm4, %v784_v19, %v367_v24 }
 0x133   : > { %v372_v27 = vmul.f32 %v371_v26, %v355_v11 }
 0x135   : > { %v376_v29 = vmul.f32 %v779_v25, %v372_v27 }
 0x137   : > { %v380_v30 = vadd.f32 %v780_v28, %v376_v29 }
 0x139   : > { %v381_v31 = vpack.c.bf16 %v380_v30, %v380_v30 }
 0x13b   : > { %670 = vmatmul.msk.bf16.vlgmr.msra.gmra.mxu0 %vm343_vm0, %v381_v31 }
 0x1b8   : > { %v410_v32 = vpop.f32.mrf.mxu0 }
 0x1b9   : > { %v414_v33 = vpack.c.bf16 %v410_v32, %v410_v32 }
 0x1bb   : > { %418 = vrot.lane.b32.xlu1 %v414_v33, %s1028_s9  ;;  %416 = vst.msk [vmem:[%s324_s17] sm:$0xf] %vm415_vm5, %v414_v33 }
 0x1bc   : > { %902 = shalt.err (!%p899_p0)
}
 0x1bd   : > { %691 = dma.vmem_to_hbm [thread:$0]  (%p1139_p2), %s451_s18, 64, %s453_s19, %s427_s24  }
 0x1be   : > { %s1029_s7 = smov 64   ;;  %s463_s1 = scalar_lea.hbm %s1267_s5, %s1181_s10 }
 0x1bf   : > { %s431_s13 = sand.u32 1, %s1096_s27   ;;  %s331_s15 = scalar_lea.vmem [#allocation9], %s1178_s29 }
 0x1c0   : > { %v412_v34 = vpop.f32.mrf.mxu0  ;;  %s465_s28 = sshll.u32 %s331_s15, 4  ;;  %s467_s11 = sshll.u32 %s463_s1, 4  ;;  %s466_s28 = int_to_ptr.vmem [resolvable:$true] %s465_s28  ;;  %s468_s11 = int_to_ptr.hbm [resolvable:$true] %s467_s11 }
 0x1c1   : > { %s478_s18 = scalar_lea.hbm %s1268_s6, %s1181_s10  ;;  %s1211_s19 = scalar_lea.sflag [#allocation10], %s431_s13 }
 0x1c2   : > { %s917_s24 = sshra.s32 %s468_s11, 4  ;;  %s923_s9 = scalar_lea.hbm %s1267_s5, 8  ;;  %s918_s24 = int_to_ptr.hbm [resolvable:$true] %s917_s24 }
 0x1c3   : > { %422 = vrot.lane.b32.xlu1 %v414_v33, %s1029_s7  ;;  %s919_s7 = scalar_lea.hbm %s918_s24, 4  ;;  %p924_p10 = scmp.lt.s32.totalorder %s918_s24, %s1267_s5 }
 0x1c4   : > { %p920_p4 = scmp.ne.s32.totalorder %s918_s24, %s919_s7  ;;  %p925_p1 = scmp.lt.s32.totalorder %s923_s9, %s919_s7 }
 0x1c6   : > { %p921_p6 = pnand %p920_p4, %p1139_p2  ;;  %p926_p3 = por %p925_p1, %p924_p10 }
 0x1c8   : > { %p922_p9 = pneg %p921_p6 }
 0x1ca   : > { %p927_p7 = pnand %p926_p3, %p922_p9 }
 0x22d   : > { %v419_v35 = vpop.permute.xlu1 %418 }
 0x22e   : > { %421 = vst.msk [vmem:[%s331_s15] sm:$0xf] %vm415_vm5, %v419_v35 }
 0x22f   : > { %930 = shalt.err (!%p927_p7)
}
 0x230   : > { %692 = dma.vmem_to_hbm [thread:$0]  (%p1139_p2), %s466_s28, 64, %s468_s11, %s1211_s19  }
 0x231   : > { %s338_s10 = scalar_lea.vmem [#allocation11], %s1178_s29  ;;  %s482_s15 = sshll.u32 %s478_s18, 4  ;;  %s483_s15 = int_to_ptr.hbm [resolvable:$true] %s482_s15 }
 0x232   : > { %s480_s13 = sshll.u32 %s338_s10, 4  ;;  %s945_s0 = sshra.s32 %s483_s15, 4  ;;  %s481_s13 = int_to_ptr.vmem [resolvable:$true] %s480_s13  ;;  %s946_s0 = int_to_ptr.hbm [resolvable:$true] %s945_s0 }
 0x233   : > { %s947_s12 = scalar_lea.hbm %s946_s0, 4  ;;  %s951_s7 = scalar_lea.hbm %s1268_s6, 8 }
 0x234   : > { %p948_p11 = scmp.ne.s32.totalorder %s946_s0, %s947_s12  ;;  %p952_p0 = scmp.lt.s32.totalorder %s946_s0, %s1268_s6 }
 0x235   : > { %v423_v36 = vpop.permute.xlu1 %422  ;;  %p953_p4 = scmp.lt.s32.totalorder %s951_s7, %s947_s12 }
 0x236   : > { %425 = vst.msk [vmem:[%s338_s10] sm:$0xf] %vm415_vm5, %v423_v36  ;;  %p949_p12 = pnand %p948_p11, %p1139_p2 }
 0x237   : > { %p954_p6 = por %p953_p4, %p952_p0 }
 0x238   : > { %p950_p13 = pneg %p949_p12 }
 0x23a   : > { %p955_p9 = pnand %p954_p6, %p950_p13 }
 0x23c   : > { %958 = shalt.err (!%p955_p9)
}
 0x23d   : > { %693 = dma.vmem_to_hbm [thread:$0]  (%p1139_p2), %s481_s13, 64, %s483_s15, %s1211_s19  }
 0x23e PF: > { %s494_s11 = sand.u32 1, %s1001_s21   ;;  %p709_p10 = pnand %p652_p8, %p1111_p5 }
 0x23f   : > { %s495_s18 = scalar_lea.sflag [#allocation4], %s494_s11 }
 0x240   : > { %p710_p1 = pneg %p709_p10 }
 0x242   : > { %992 = dma.done.wait (%p710_p1), %s495_s18, 64  }
 0x243   : > { %994 = vsyncadd (%p710_p1), %s495_s18, 4294967232  ;;  %s1278_s27 = sadd.s32 4294967294, %s1021_s26  }
 0x244   : > { %s504_s17 = sand.u32 1, %s1278_s27  }
 0x245   : > { %s505_s9 = scalar_lea.sflag [#allocation10], %s504_s17 }
 0x246   : > { %996 = dma.done.wait (%p710_p1), %s505_s9, 128  }
 0x247   : > { %998 = vsyncadd (%p710_p1), %s505_s9, 4294967168  ;;  %s27_s26 = sadd.s32 1, %s1021_s26   ;;  %s1279_s21 = smov %s1005_s22 }
 0x248   : > { %p24_p2 = scmp.ge.s32.totalorder %s27_s26, 4   ;;  %s1280_s22 = smov %s1009_s23 }
 0x249   : > { %s1281_s23 = smov %s1149_s14  ;;  %s1282_s24 = smov %s1017_s25 }
 0x24a   : > { %s1283_s25 = smov %s1285_s20  ;;  %26 = sbr.rel (!%p24_p2) target bundleno = 12 (0xc), region = 121 }
 0x24f   :  { %521 = vsyncpa [#allocation3], 1 }
 0x250   :  { %523 = vsyncpa [#allocation3 + $0x1], 1 }
 0x251   :  { %524 = vsyncpa [#allocation6], 1 }
 0x252   :  { %525 = vsyncpa [#allocation4], 1 }
 0x253   :  { %527 = vsyncpa [#allocation4 + $0x1], 1 }
 0x254   :  { %528 = vsyncpa [#allocation10], 1 }
 0x255   :  { %530 = vsyncpa [#allocation10 + $0x1], 1 }

</bundles_post_ra>
